<compile_context>
chip_gen: v5e
topology: v5e:2x2
jax: 0.10.0
libtpu: 0.0.40
codegen_flags: <defaults>
</compile_context>

<pallas_src>
import functools

import numpy as np
import jax
import jax.numpy as jnp
from jax.experimental import pallas as pl
from jax.experimental.pallas import tpu as pltpu

_LANES = 128
_SUBLANES = 8


def _sublane_pack(itemsize):
    # f32 -> 8, bf16 -> 16, int8/fp8 -> 32 sublanes per packed vreg row.
    return (4 // max(1, itemsize)) * _SUBLANES


def _augment_loss_kernel(lens_ref, keep_ref, aug_ref, logits_ref, targets_ref,
                         out_ref, m_sc, s_sc, g_sc,
                         *, seq_len, vocab, t_tile, v_chunk, mask_vocab):
    """One (batch row, token tile, vocab chunk) grid cell.

    lens_ref/keep_ref/aug_ref : (B,) SMEM scalar-prefetch (int32/int32/f32)
    logits_ref                : (t_tile, v_chunk) VMEM, model dtype
    targets_ref               : (t_tile, 1) int32 VMEM (fetched once per (b,t))
    out_ref                   : (1, 8, 128) f32 VMEM, resident across (t, v);
                                lane 0 = sum(loss)*aug, lane 1 = aug*min(lens,T)
    m_sc/s_sc/g_sc            : (t_tile, 1) f32 online-logsumexp scratch
    """
    b = pl.program_id(0)
    t = pl.program_id(1)
    v = pl.program_id(2)
    num_v = pl.num_programs(2)
    keep_b = keep_ref[b]

    lane8 = jax.lax.broadcasted_iota(jnp.int32, (_SUBLANES, _LANES), 1)

    # ---- row prologue: init the resident per-row accumulator block. ----
    # The length-mask sum is purely scalar: aug * clip(lens, 0, T).  aug == 0
    # rows therefore contribute exactly 0 to both lanes.
    @pl.when((t == 0) & (v == 0))
    def _init_row():
        aug_b = aug_ref[b]
        mask_sum = aug_b * jnp.clip(lens_ref[b], 0, seq_len).astype(jnp.float32)
        out_ref[...] = jnp.where(lane8 == 1, mask_sum, 0.0).reshape(
            1, _SUBLANES, _LANES)

    # ---- per-token cross entropy, vocab-chunked (skipped for aug == 0). ----
    @pl.when(keep_b != 0)
    def _compute():
        @pl.when(v == 0)
        def _init_token_tile():
            m_sc[...] = jnp.full_like(m_sc, -jnp.inf)
            s_sc[...] = jnp.zeros_like(s_sc)
            g_sc[...] = jnp.zeros_like(g_sc)

        raw = logits_ref[...]                          # (tt, vc) native dtype
        x = raw.astype(jnp.float32)                    # single f32 consumer
        lane_idx = jax.lax.broadcasted_iota(jnp.int32, (t_tile, v_chunk), 1)
        if mask_vocab:
            # Only emitted when v_chunk does not divide V: neutralize the
            # out-of-vocab lanes of the last chunk before max / exp.
            x = jnp.where(v * v_chunk + lane_idx < vocab, x, -jnp.inf)

        # Online logsumexp across vocab chunks.
        m_old = m_sc[...]
        m_new = jnp.maximum(m_old, jnp.max(x, axis=-1, keepdims=True))
        s_sc[...] = (s_sc[...] * jnp.exp(m_old - m_new)
                     + jnp.sum(jnp.exp(x - m_new), axis=-1, keepdims=True))
        m_sc[...] = m_new

        # Target-logit gather straight from the raw tile (exactly one nonzero
        # per row -> exact even in bf16); cast only the reduced column.
        # NOTE: targets are assumed to lie in [0, V); an out-of-range
        # pad/ignore id would contribute loss = logsumexp, as in the original
        # one-hot/CE formulation with reduction='none'.
        tgt_local = targets_ref[...] - v * v_chunk     # (tt, 1) int32
        hit = lane_idx == tgt_local
        g_sc[...] += jnp.sum(jnp.where(hit, raw, jnp.zeros([], raw.dtype)),
                             axis=-1, keepdims=True).astype(jnp.float32)

        @pl.when(v == num_v - 1)
        def _finalize_token_tile():
            loss_tok = m_sc[...] + jnp.log(s_sc[...]) - g_sc[...]   # (tt, 1)
            # Mask rows of the (possibly partial) last token tile before any
            # cross-row reduction.
            t_global = t * t_tile + jax.lax.broadcasted_iota(
                jnp.int32, (t_tile, 1), 0)
            loss_tok = jnp.where(t_global < seq_len, loss_tok, 0.0)
            sum_loss = jnp.sum(loss_tok) * aug_ref[b]
            out_ref[...] += jnp.where(lane8 == 0, sum_loss, 0.0).reshape(
                1, _SUBLANES, _LANES)


def _vmem_capacity_bytes():
    try:
        return int(pltpu.get_tpu_info().vmem_capacity_bytes)
    except Exception:
        return 64 * 1024 * 1024  # conservative (v7x-sized) fallback


def _pick_tiles(T, V, itemsize, vmem_cap):
    """Choose (t_tile, v_chunk) so the real working set fits ~1/4 of VMEM."""
    v_chunk = V if V <= 2048 else 2048          # full dim, or 128-mult chunks
    pack = _sublane_pack(itemsize)
    per_row = (v_chunk * (2 * itemsize + 3 * 4)  # 2x logits buf + f32 interm.
               + 2 * _LANES * 4                  # lane-padded targets block
               + 3 * _LANES * 4)                 # m/s/g scratch rows
    rows = max(pack, (vmem_cap // 4) // per_row)
    t_tile = min(512, (rows // pack) * pack)
    if t_tile >= T:
        t_tile = T                               # full-dim block always legal
    return t_tile, v_chunk


def _validate_tiles(T, V, itemsize, t_tile, v_chunk):
    pack = _sublane_pack(itemsize)
    if t_tile < 1 or not (t_tile == T or t_tile % pack == 0):
        raise ValueError(
            f"t_tile={t_tile} must equal T={T} or be a multiple of {pack} "
            f"for itemsize={itemsize}")
    if v_chunk < 1 or not (v_chunk == V or v_chunk % _LANES == 0):
        raise ValueError(
            f"v_chunk={v_chunk} must equal V={V} or be a multiple of {_LANES}")


def augment_loss(logits, targets, lens, aug_mask, eps=1e-12,
                 t_tile=None, v_chunk=None):
    """AugmentLossWrapper forward: loss.sum() / (mask.sum() + eps).

    logits   : (B, T, V) model dtype (bf16 recommended; upcast in-kernel)
    targets  : (B, T)    integer class ids in [0, V)
    lens     : (B,)      valid token count per sample
    aug_mask : (B,)      augmentation keep-mask (0 disables a row; nonzero
                         values are used as float weights, matching the
                         reference's float multiply)
    """
    B, T, V = logits.shape
    itemsize = logits.dtype.itemsize
    vmem_cap = _vmem_capacity_bytes()
    auto_t, auto_v = _pick_tiles(T, V, itemsize, vmem_cap)
    if t_tile is None:
        t_tile = auto_t
    if v_chunk is None:
        v_chunk = auto_v
    v_chunk = min(v_chunk, V)
    _validate_tiles(T, V, itemsize, t_tile, v_chunk)

    num_t = pl.cdiv(T, t_tile)
    num_v = pl.cdiv(V, v_chunk)
    mask_vocab = (V % v_chunk) != 0

    kernel = functools.partial(
        _augment_loss_kernel, seq_len=T, vocab=V,
        t_tile=t_tile, v_chunk=v_chunk, mask_vocab=mask_vocab)

    # Masked rows (keep == 0) collapse every block index to (0, 0, 0); since
    # consecutive identical block indices dedup, their logits/targets DMA is
    # skipped after the first step of the row.
    def logits_map(b, t, v, lens_ref, keep_ref, aug_ref):
        k = keep_ref[b]
        return (b * k, t * k, v * k)

    def targets_map(b, t, v, lens_ref, keep_ref, aug_ref):
        k = keep_ref[b]
        return (b * k, t * k, 0)          # v ignored -> one fetch per (b, t)

    def out_map(b, t, v, lens_ref, keep_ref, aug_ref):
        return (b, 0, 0)                  # resident across t, v (accumulator)

    grid_spec = pltpu.PrefetchScalarGridSpec(
        num_scalar_prefetch=3,            # lens, keep, aug -> SMEM
        grid=(B, num_t, num_v),
        in_specs=[
            pl.BlockSpec((pl.Squeezed(), t_tile, v_chunk), logits_map),
            pl.BlockSpec((pl.Squeezed(), t_tile, 1), targets_map),
        ],
        out_specs=pl.BlockSpec((1, _SUBLANES, _LANES), out_map),
        scratch_shapes=[pltpu.VMEM((t_tile, 1), jnp.float32)] * 3,
    )

    cost = pl.CostEstimate(
        flops=int(6 * B * T * V),
        transcendentals=int(B * T * V),
        bytes_accessed=int(B * T * V * itemsize + B * T * 4
                           + B * _SUBLANES * _LANES * 4),
    )

    partials = pl.pallas_call(
        kernel,
        out_shape=jax.ShapeDtypeStruct((B, _SUBLANES, _LANES), jnp.float32),
        grid_spec=grid_spec,
        compiler_params=pltpu.CompilerParams(
            dimension_semantics=("parallel", "arbitrary", "arbitrary"),
            vmem_limit_bytes=int(vmem_cap * 3 // 4),
        ),
        cost_estimate=cost,
    )(
        lens.astype(jnp.int32),
        (aug_mask != 0).astype(jnp.int32),
        aug_mask.astype(jnp.float32),
        logits,
        targets.reshape(B, T, 1).astype(jnp.int32),
    )

    total_loss = jnp.sum(partials[:, 0, 0])
    total_mask = jnp.sum(partials[:, 0, 1])
    return total_loss / (total_mask + eps)


def _reference(logits, targets, lens, aug_mask, eps):
    logits = logits.astype(jnp.float32)
    logp = jax.nn.log_softmax(logits, axis=-1)
    loss = -jnp.take_along_axis(
        logp, targets[..., None].astype(jnp.int32), axis=-1)[..., 0]
    loss = loss * aug_mask[:, None]
    T = logits.shape[1]
    t = jnp.arange(T)[None, :]
    len_mask = (t < lens[:, None]).astype(jnp.float32) * aug_mask[:, None]
    return loss.sum() / (len_mask.sum() + eps)


if __name__ == "__main__":
    B, T, V = 8, 20, 256
    eps = 1e-12
    key = jax.random.PRNGKey(0)
    k_logits, k_targets, k_lens, k_bern = jax.random.split(key, 4)

    # Logits shipped in bf16 (native activation dtype); kernel upcasts per chunk.
    logits = jax.random.normal(
        k_logits, (B, T, V), dtype=jnp.float32).astype(jnp.bfloat16)
    targets = jax.random.randint(k_targets, (B, T), 0, V, dtype=jnp.int32)
    lens = jax.random.randint(k_lens, (B,), 4, T + 1, dtype=jnp.int32)

    # Host-side glue reproducing the module's aug_mask construction:
    #   aug_mask = ['aug' not in cap_id for cap_id in cap_ids]
    #   use_aug  = random choice with p = use_aug_prob for the augmented rows
    cap_ids = ["vid0", "vid1_aug", "vid2", "vid3_aug",
               "vid4", "vid5_aug", "vid6", "vid7_aug"]
    use_aug_prob = 0.5
    aug_mask_np = np.array(["aug" not in c for c in cap_ids])
    n_aug = int((~aug_mask_np).sum())
    # TODO(synk): exact np.random.choice RNG semantics are not reproducible in
    # JAX; a deterministic jax.random.bernoulli with the same probability is
    # used instead (same distribution, same downstream math).
    use_aug = np.asarray(
        jax.random.bernoulli(k_bern, p=use_aug_prob, shape=(n_aug,))
    ).astype(bool)
    aug_mask_np[~aug_mask_np] = use_aug
    aug_mask = jnp.asarray(aug_mask_np, dtype=jnp.float32)

    ref = _reference(logits, targets, lens, aug_mask, eps)

    # Explicit small tiles exercise the multi-tile token grid (partial last
    # tile), the multi-chunk online logsumexp, and the masked-row DMA skip;
    # the second call uses the VMEM-budget-derived auto configuration.
    out_tiled = augment_loss(logits, targets, lens, aug_mask, eps=eps,
                             t_tile=16, v_chunk=128)
    out_auto = augment_loss(logits, targets, lens, aug_mask, eps=eps)
    out_tiled, out_auto = jax.block_until_ready((out_tiled, out_auto))

    assert np.allclose(np.asarray(out_tiled), np.asarray(ref),
                       rtol=1e-4, atol=1e-4), (out_tiled, ref)
    assert np.allclose(np.asarray(out_auto), np.asarray(ref),
                       rtol=1e-4, atol=1e-4), (out_auto, ref)

    print("KERNEL_OK")
</pallas_src>

<mosaic_0001>
module attributes {stable_mosaic.version = 11 : i64} {
  func.func @_augment_loss_kernel(%arg0: i32, %arg1: i32, %arg2: i32, %arg3: memref<8xi32, #tpu.memory_space<smem>>, %arg4: memref<8xi32, #tpu.memory_space<smem>>, %arg5: memref<8xf32, #tpu.memory_space<smem>>, %arg6: memref<1x16x128xbf16, #tpu.memory_space<vmem>>, %arg7: memref<1x16x1xi32, #tpu.memory_space<vmem>>, %arg8: memref<1x8x128xf32, #tpu.memory_space<vmem>>, %arg9: memref<16x1xf32, #tpu.memory_space<vmem>>, %arg10: memref<16x1xf32, #tpu.memory_space<vmem>>, %arg11: memref<16x1xf32, #tpu.memory_space<vmem>>) attributes {dimension_semantics = [#tpu.dimension_semantics<parallel>, #tpu.dimension_semantics<arbitrary>, #tpu.dimension_semantics<arbitrary>], iteration_bounds = array<i64: 8, 2, 2>, scalar_prefetch = 3 : i64, scratch_operands = 3 : i64, tpu.core_type = #tpu.core_type<tc>, window_params = [{transform_indices = @transform_0, window_bounds = array<i64: 1, 16, 128>}, {transform_indices = @transform_1, window_bounds = array<i64: 1, 16, 1>}, {transform_indices = @transform_2, window_bounds = array<i64: 1, 8, 128>}]} {
    %0 = arith.index_cast %arg0 : i32 to index
    %1 = memref.load %arg4[%0] : memref<8xi32, #tpu.memory_space<smem>>
    %2 = tpu.iota {dimensions = array<i32: 1>} : vector<8x128xi32>
    %c0_i32 = arith.constant 0 : i32
    %3 = arith.cmpi eq, %arg1, %c0_i32 : i32
    %c0_i32_0 = arith.constant 0 : i32
    %4 = arith.cmpi eq, %arg2, %c0_i32_0 : i32
    %5 = arith.andi %3, %4 : i1
    %6 = arith.extui %5 : i1 to i32
    %c0_i32_1 = arith.constant 0 : i32
    %7 = arith.cmpi ne, %6, %c0_i32_1 : i32
    scf.if %7 {
      %11 = arith.index_cast %arg0 : i32 to index
      %12 = memref.load %arg5[%11] : memref<8xf32, #tpu.memory_space<smem>>
      %13 = arith.index_cast %arg0 : i32 to index
      %14 = memref.load %arg3[%13] : memref<8xi32, #tpu.memory_space<smem>>
      %c0_i32_4 = arith.constant 0 : i32
      %c20_i32 = arith.constant 20 : i32
      %15 = arith.maxsi %c0_i32_4, %14 : i32
      %16 = arith.minsi %c20_i32, %15 : i32
      %17 = arith.sitofp %16 : i32 to f32
      %18 = arith.mulf %12, %17 : f32
      %c1_i32 = arith.constant 1 : i32
      %19 = vector.broadcast %c1_i32 : i32 to vector<8x128xi32>
      %20 = arith.cmpi eq, %2, %19 : vector<8x128xi32>
      %cst = arith.constant 0.000000e+00 : f32
      %21 = vector.broadcast %18 : f32 to vector<8x128xf32>
      %22 = vector.broadcast %cst : f32 to vector<8x128xf32>
      %23 = arith.select %20, %21, %22 : vector<8x128xi1>, vector<8x128xf32>
      %24 = vector.shape_cast %23 : vector<8x128xf32> to vector<1x8x128xf32>
      %c0 = arith.constant 0 : index
      %c0_5 = arith.constant 0 : index
      %c0_6 = arith.constant 0 : index
      %25 = vector.load %arg8[%c0, %c0_5, %c0_6] : memref<1x8x128xf32, #tpu.memory_space<vmem>>, vector<1x8x128xf32>
      tpu.vector_store %arg8[%c0, %c0_5, %c0_6], %24 {strides = array<i32>} : memref<1x8x128xf32, #tpu.memory_space<vmem>>, vector<1x8x128xf32>,
    } else {
    }
    %c0_i32_2 = arith.constant 0 : i32
    %8 = arith.cmpi ne, %1, %c0_i32_2 : i32
    %9 = arith.extui %8 : i1 to i32
    %c0_i32_3 = arith.constant 0 : i32
    %10 = arith.cmpi ne, %9, %c0_i32_3 : i32
    scf.if %10 {
      %c0_i32_4 = arith.constant 0 : i32
      %11 = arith.cmpi eq, %arg2, %c0_i32_4 : i32
      %12 = arith.extui %11 : i1 to i32
      %c0_i32_5 = arith.constant 0 : i32
      %13 = arith.cmpi ne, %12, %c0_i32_5 : i32
      scf.if %13 {
        %cst_27 = arith.constant 0xFF800000 : f32
        %54 = vector.broadcast %cst_27 : f32 to vector<16x1xf32>
        %c0_28 = arith.constant 0 : index
        %c0_29 = arith.constant 0 : index
        %55 = vector.load %arg9[%c0_28, %c0_29] : memref<16x1xf32, #tpu.memory_space<vmem>>, vector<16x1xf32>
        tpu.vector_store %arg9[%c0_28, %c0_29], %54 {strides = array<i32>} : memref<16x1xf32, #tpu.memory_space<vmem>>, vector<16x1xf32>,
        %cst_30 = arith.constant 0.000000e+00 : f32
        %56 = vector.broadcast %cst_30 : f32 to vector<16x1xf32>
        %c0_31 = arith.constant 0 : index
        %c0_32 = arith.constant 0 : index
        %57 = vector.load %arg10[%c0_31, %c0_32] : memref<16x1xf32, #tpu.memory_space<vmem>>, vector<16x1xf32>
        tpu.vector_store %arg10[%c0_31, %c0_32], %56 {strides = array<i32>} : memref<16x1xf32, #tpu.memory_space<vmem>>, vector<16x1xf32>,
        %cst_33 = arith.constant 0.000000e+00 : f32
        %58 = vector.broadcast %cst_33 : f32 to vector<16x1xf32>
        %c0_34 = arith.constant 0 : index
        %c0_35 = arith.constant 0 : index
        %59 = vector.load %arg11[%c0_34, %c0_35] : memref<16x1xf32, #tpu.memory_space<vmem>>, vector<16x1xf32>
        tpu.vector_store %arg11[%c0_34, %c0_35], %58 {strides = array<i32>} : memref<16x1xf32, #tpu.memory_space<vmem>>, vector<16x1xf32>,
      } else {
      }
      %c0 = arith.constant 0 : index
      %c0_6 = arith.constant 0 : index
      %c0_7 = arith.constant 0 : index
      %14 = vector.load %arg6[%c0, %c0_6, %c0_7] : memref<1x16x128xbf16, #tpu.memory_space<vmem>>, vector<1x16x128xbf16>
      %15 = vector.shape_cast %14 : vector<1x16x128xbf16> to vector<16x128xbf16>
      %16 = arith.extf %15 : vector<16x128xbf16> to vector<16x128xf32>
      %17 = tpu.iota {dimensions = array<i32: 1>} : vector<16x128xi32>
      %c0_8 = arith.constant 0 : index
      %c0_9 = arith.constant 0 : index
      %18 = vector.load %arg9[%c0_8, %c0_9] : memref<16x1xf32, #tpu.memory_space<vmem>>, vector<16x1xf32>
      %cst = arith.constant dense<0xFF800000> : vector<16xf32>
      %19 = vector.multi_reduction <maximumf>, %16, %cst [1] : vector<16x128xf32> to vector<16xf32>
      %20 = vector.shape_cast %19 : vector<16xf32> to vector<16x1xf32>
      %21 = arith.maximumf %18, %20 : vector<16x1xf32>
      %c0_10 = arith.constant 0 : index
      %c0_11 = arith.constant 0 : index
      %22 = vector.load %arg10[%c0_10, %c0_11] : memref<16x1xf32, #tpu.memory_space<vmem>>, vector<16x1xf32>
      %23 = arith.subf %18, %21 : vector<16x1xf32>
      %24 = math.exp %23 : vector<16x1xf32>
      %25 = arith.mulf %22, %24 : vector<16x1xf32>
      %26 = vector.broadcast %21 : vector<16x1xf32> to vector<16x128xf32>
      %27 = arith.subf %16, %26 : vector<16x128xf32>
      %28 = math.exp %27 : vector<16x128xf32>
      %cst_12 = arith.constant dense<0.000000e+00> : vector<16xf32>
      %29 = vector.multi_reduction <add>, %28, %cst_12 [1] : vector<16x128xf32> to vector<16xf32>
      %30 = vector.shape_cast %29 : vector<16xf32> to vector<16x1xf32>
      %31 = arith.addf %25, %30 : vector<16x1xf32>
      %c0_13 = arith.constant 0 : index
      %c0_14 = arith.constant 0 : index
      %32 = vector.load %arg10[%c0_13, %c0_14] : memref<16x1xf32, #tpu.memory_space<vmem>>, vector<16x1xf32>
      tpu.vector_store %arg10[%c0_13, %c0_14], %31 {strides = array<i32>} : memref<16x1xf32, #tpu.memory_space<vmem>>, vector<16x1xf32>,
      %c0_15 = arith.constant 0 : index
      %c0_16 = arith.constant 0 : index
      %33 = vector.load %arg9[%c0_15, %c0_16] : memref<16x1xf32, #tpu.memory_space<vmem>>, vector<16x1xf32>
      tpu.vector_store %arg9[%c0_15, %c0_16], %21 {strides = array<i32>} : memref<16x1xf32, #tpu.memory_space<vmem>>, vector<16x1xf32>,
      %c0_17 = arith.constant 0 : index
      %c0_18 = arith.constant 0 : index
      %c0_19 = arith.constant 0 : index
      %34 = vector.load %arg7[%c0_17, %c0_18, %c0_19] : memref<1x16x1xi32, #tpu.memory_space<vmem>>, vector<1x16x1xi32>
      %35 = vector.shape_cast %34 : vector<1x16x1xi32> to vector<16x1xi32>
      %c128_i32 = arith.constant 128 : i32
      %36 = arith.muli %arg2, %c128_i32 : i32
      %37 = vector.broadcast %36 : i32 to vector<16x1xi32>
      %38 = arith.subi %35, %37 : vector<16x1xi32>
      %39 = vector.broadcast %38 : vector<16x1xi32> to vector<16x128xi32>
      %40 = arith.cmpi eq, %17, %39 : vector<16x128xi32>
      %c0_20 = arith.constant 0 : index
      %c0_21 = arith.constant 0 : index
      %41 = vector.load %arg11[%c0_20, %c0_21] : memref<16x1xf32, #tpu.memory_space<vmem>>, vector<16x1xf32>
      %cst_22 = arith.constant 0.000000e+00 : bf16
      %42 = vector.broadcast %cst_22 : bf16 to vector<16x128xbf16>
      %43 = arith.select %40, %15, %42 : vector<16x128xi1>, vector<16x128xbf16>
      %44 = arith.extf %43 : vector<16x128xbf16> to vector<16x128xf32>
      %cst_23 = arith.constant dense<0.000000e+00> : vector<16xf32>
      %45 = vector.multi_reduction <add>, %44, %cst_23 [1] : vector<16x128xf32> to vector<16xf32>
      %46 = vector.shape_cast %45 : vector<16xf32> to vector<16x1xf32>
      %47 = arith.truncf %46 : vector<16x1xf32> to vector<16x1xbf16>
      %48 = arith.extf %47 : vector<16x1xbf16> to vector<16x1xf32>
      %49 = arith.addf %41, %48 : vector<16x1xf32>
      %c0_24 = arith.constant 0 : index
      %c0_25 = arith.constant 0 : index
      %50 = vector.load %arg11[%c0_24, %c0_25] : memref<16x1xf32, #tpu.memory_space<vmem>>, vector<16x1xf32>
      tpu.vector_store %arg11[%c0_24, %c0_25], %49 {strides = array<i32>} : memref<16x1xf32, #tpu.memory_space<vmem>>, vector<16x1xf32>,
      %c1_i32 = arith.constant 1 : i32
      %51 = arith.cmpi eq, %arg2, %c1_i32 : i32
      %52 = arith.extui %51 : i1 to i32
      %c0_i32_26 = arith.constant 0 : i32
      %53 = arith.cmpi ne, %52, %c0_i32_26 : i32
      scf.if %53 {
        %c0_27 = arith.constant 0 : index
        %c0_28 = arith.constant 0 : index
        %54 = vector.load %arg9[%c0_27, %c0_28] : memref<16x1xf32, #tpu.memory_space<vmem>>, vector<16x1xf32>
        %c0_29 = arith.constant 0 : index
        %c0_30 = arith.constant 0 : index
        %55 = vector.load %arg10[%c0_29, %c0_30] : memref<16x1xf32, #tpu.memory_space<vmem>>, vector<16x1xf32>
        %56 = math.log %55 : vector<16x1xf32>
        %57 = arith.addf %54, %56 : vector<16x1xf32>
        %c0_31 = arith.constant 0 : index
        %c0_32 = arith.constant 0 : index
        %58 = vector.load %arg11[%c0_31, %c0_32] : memref<16x1xf32, #tpu.memory_space<vmem>>, vector<16x1xf32>
        %59 = arith.subf %57, %58 : vector<16x1xf32>
        %c16_i32 = arith.constant 16 : i32
        %60 = arith.muli %arg1, %c16_i32 : i32
        %61 = tpu.iota {dimensions = array<i32: 0>} : vector<16x1xi32>
        %62 = vector.broadcast %60 : i32 to vector<16x1xi32>
        %63 = arith.addi %62, %61 : vector<16x1xi32>
        %c20_i32 = arith.constant 20 : i32
        %64 = vector.broadcast %c20_i32 : i32 to vector<16x1xi32>
        %65 = arith.cmpi slt, %63, %64 : vector<16x1xi32>
        %cst_33 = arith.constant 0.000000e+00 : f32
        %66 = vector.broadcast %cst_33 : f32 to vector<16x1xf32>
        %67 = arith.select %65, %59, %66 : vector<16x1xi1>, vector<16x1xf32>
        %68 = vector.shape_cast %67 : vector<16x1xf32> to vector<1x16x1xf32>
        %cst_34 = arith.constant dense<0.000000e+00> : vector<1xf32>
        %69 = vector.multi_reduction <add>, %68, %cst_34 [1, 2] : vector<1x16x1xf32> to vector<1xf32>
        %70 = vector.shape_cast %69 : vector<1xf32> to vector<1x1x1xf32>
        %71 = vector.extract %70[0, 0, 0] : f32 from vector<1x1x1xf32>
        %72 = arith.index_cast %arg0 : i32 to index
        %73 = memref.load %arg5[%72] : memref<8xf32, #tpu.memory_space<smem>>
        %74 = arith.mulf %71, %73 : f32
        %c0_35 = arith.constant 0 : index
        %c0_36 = arith.constant 0 : index
        %c0_37 = arith.constant 0 : index
        %75 = vector.load %arg8[%c0_35, %c0_36, %c0_37] : memref<1x8x128xf32, #tpu.memory_space<vmem>>, vector<1x8x128xf32>
        %c0_i32_38 = arith.constant 0 : i32
        %76 = vector.broadcast %c0_i32_38 : i32 to vector<8x128xi32>
        %77 = arith.cmpi eq, %2, %76 : vector<8x128xi32>
        %cst_39 = arith.constant 0.000000e+00 : f32
        %78 = vector.broadcast %74 : f32 to vector<8x128xf32>
        %79 = vector.broadcast %cst_39 : f32 to vector<8x128xf32>
        %80 = arith.select %77, %78, %79 : vector<8x128xi1>, vector<8x128xf32>
        %81 = vector.shape_cast %80 : vector<8x128xf32> to vector<1x8x128xf32>
        %82 = arith.addf %75, %81 : vector<1x8x128xf32>
        %c0_40 = arith.constant 0 : index
        %c0_41 = arith.constant 0 : index
        %c0_42 = arith.constant 0 : index
        %83 = vector.load %arg8[%c0_40, %c0_41, %c0_42] : memref<1x8x128xf32, #tpu.memory_space<vmem>>, vector<1x8x128xf32>
        tpu.vector_store %arg8[%c0_40, %c0_41, %c0_42], %82 {strides = array<i32>} : memref<1x8x128xf32, #tpu.memory_space<vmem>>, vector<1x8x128xf32>,
      } else {
      }
    } else {
    }
    return
  }
  func.func @transform_0(%arg0: i32, %arg1: i32, %arg2: i32, %arg3: memref<8xi32, #tpu.memory_space<smem>>, %arg4: memref<8xi32, #tpu.memory_space<smem>>, %arg5: memref<8xf32, #tpu.memory_space<smem>>) -> (i32, i32, i32) {
    %0 = arith.index_cast %arg0 : i32 to index
    %1 = memref.load %arg4[%0] : memref<8xi32, #tpu.memory_space<smem>>
    %2 = arith.muli %arg0, %1 : i32
    %3 = arith.muli %arg1, %1 : i32
    %4 = arith.muli %arg2, %1 : i32
    %c0_i32 = arith.constant 0 : i32
    return %2, %3, %4 : i32, i32, i32
  }
  func.func @transform_1(%arg0: i32, %arg1: i32, %arg2: i32, %arg3: memref<8xi32, #tpu.memory_space<smem>>, %arg4: memref<8xi32, #tpu.memory_space<smem>>, %arg5: memref<8xf32, #tpu.memory_space<smem>>) -> (i32, i32, i32) {
    %0 = arith.index_cast %arg0 : i32 to index
    %1 = memref.load %arg4[%0] : memref<8xi32, #tpu.memory_space<smem>>
    %2 = arith.muli %arg0, %1 : i32
    %3 = arith.muli %arg1, %1 : i32
    %c0_i32 = arith.constant 0 : i32
    %c0_i32_0 = arith.constant 0 : i32
    return %2, %3, %c0_i32 : i32, i32, i32
  }
  func.func @transform_2(%arg0: i32, %arg1: i32, %arg2: i32, %arg3: memref<8xi32, #tpu.memory_space<smem>>, %arg4: memref<8xi32, #tpu.memory_space<smem>>, %arg5: memref<8xf32, #tpu.memory_space<smem>>) -> (i32, i32, i32) {
    %c0_i32 = arith.constant 0 : i32
    %c0_i32_0 = arith.constant 0 : i32
    %c0_i32_1 = arith.constant 0 : i32
    return %arg0, %c0_i32, %c0_i32_0 : i32, i32, i32
  }
}

</mosaic_0001>

<bundles_post_ra>
// kernel: tpu_custom_call.1
= control target key start
LH: loop header
LB: loop body
LE: loop exit
PB: predicated region body
PF: predicated region fallthrough
CT: control target
= control target key end

     0   :  { %s1204_s24 = smov [#allocation6]   ;;  %s1205_s25 = smov [#allocation7]   ;;  %s1521_s0 = inlined_call_operand.vmem [shape: s32[8], index: 0, kind: input, shape index: {}]   ;;  %s1522_s3 = inlined_call_operand.vmem [shape: bf16[8,20,256], index: 3, kind: input, shape index: {}]   ;;  %s1523_s4 = inlined_call_operand.vmem [shape: s32[8,20,1], index: 4, kind: input, shape index: {}]   ;;  %s1524_s5 = inlined_call_operand.hbm [shape: f32[8,8,128], index: 5, kind: output, shape index: {}]   ;;  %s1525_s1 = inlined_call_operand.vmem [shape: s32[8], index: 1, kind: input, shape index: {}]   ;;  %s1526_s2 = inlined_call_operand.vmem [shape: f32[8], index: 2, kind: input, shape index: {}]  }
   0x1   :  { %1537 = sst [smem:[#allocation20_spill]] %s1522_s3  ;;  %s11_s20 = sshll.u32 %s1521_s0, 4  ;;  %s12_s20 = int_to_ptr.vmem [resolvable:$true] %s11_s20 }
   0x2   :  { %1538 = sst [smem:[#allocation21_spill]] %s1523_s4  ;;  %s16_s23 = sshll.u32 %s1525_s1, 4  ;;  %s17_s23 = int_to_ptr.vmem [resolvable:$true] %s16_s23 }
   0x3   :  { %1539 = sst [smem:[#allocation22_spill]] %s1524_s5  ;;  %s21_s28 = sshll.u32 %s1526_s2, 4  ;;  %s22_s28 = int_to_ptr.vmem [resolvable:$true] %s21_s28 }
   0x4   :  { %14 = dma.vmem_to_smem %s12_s20, 16, %s1204_s24, [#allocation5] }
   0x5   :  { %19 = dma.vmem_to_smem %s17_s23, 16, %s1205_s25, [#allocation5] }
   0x6   :  { %s1206_s29 = smov [#allocation8]  }
   0x7   :  { %24 = dma.vmem_to_smem %s22_s28, 16, %s1206_s29, [#allocation5] }
   0x8   :  { %1118 = dma.done.wait [#allocation5], 48 }
   0x9   :  { %1119 = vsyncadd [#allocation5], 4294967248 }
   0xa   :  { %27 = sfence }
   0xb   :  { %28 = vsyncpa [#allocation11], 0 }
   0xc   :  { %30 = vsyncpa [#allocation11 + $0x1], 0  ;;  %s1249_s0 = smov 0   ;;  %s1251_s1 = smov 0  }
   0xd   :  { %s1253_s30 = smov 0   ;;  %s1255_s6 = smov 0  }
   0xe   :  { %s1257_s7 = smov 0   ;;  %s1259_s8 = smov 0  }
   0xf   :  { %s1261_s2 = smov 0   ;;  %s1263_s9 = smov 0  }
  0x10   :  { %s1265_s10 = smov 0   ;;  %s1267_s11 = smov 0  }
  0x11   :  { %s1269_s12 = smov 0   ;;  %s1271_s13 = smov 0  }
  0x12 LB: > { %1540 = sst [smem:[#allocation14_spill]] %s1126_s0  ;;  %s48_s14 = sadd.s32 1, %s1158_s10  ;;  %s1170_s13 = sphi %s1271_s13, %s36_s13   ;;  %s1166_s12 = sphi %s1269_s12, %s1577_s12   ;;  %s1162_s11 = sphi %s1267_s11, %s1576_s11   ;;  %s1158_s10 = sphi %s1265_s10, %s1575_s10   ;;  %s1154_s9 = sphi %s1263_s9, %s1574_s9   ;;  %s1150_s2 = sphi %s1261_s2, %s1573_s2   ;;  %s1146_s8 = sphi %s1259_s8, %s1572_s8   ;;  %s1142_s7 = sphi %s1257_s7, %s1571_s7   ;;  %s1138_s6 = sphi %s1255_s6, %s1570_s6   ;;  %s1134_s30 = sphi %s1253_s30, %s1569_s30   ;;  %s1130_s1 = sphi %s1251_s1, %s1568_s1   ;;  %s1126_s0 = sphi %s1249_s0, %s1567_s0  }
  0x13   : > { %1541 = sst [smem:[#allocation15_spill]] %s1146_s8  ;;  %p49_p0 = scmp.ge.s32.totalorder %s48_s14, 2 }
  0x14   : > { %1542 = sst [smem:[#allocation16_spill]] %s1150_s2  ;;  %s51_s15 = sadd.s32 1, %s1162_s11 }
  0x15   : > { %1543 = sst [smem:[#allocation17_spill]] %s1154_s9  ;;  %s738_s16 = sadd.s32 4294967295, %s1170_s13  }
  0x16   : > { %s55_s17 = sadd.s32 1, %s1166_s12  ;;  %s1579_s14 = smov (%p49_p0, %s48_s14), 0 }
  0x17   : > { %s1581_s15 = smov (!%p49_p0, %s51_s15), %s1162_s11  ;;  %p81_p1 = scmp.ne.s32.totalorder %s1142_s7, %s1138_s6 }
  0x18   : > { %p82_p2 = scmp.eq.s32.totalorder %s1170_s13, 0  ;;  %p53_p3 = scmp.ge.s32.totalorder %s1581_s15, 2 }
  0x19   : > { %s59_s18 = sld [smem:[#allocation7 + %s1166_s12]]  ;;  %p144_p5 = scmp.ne.s32.totalorder %s1134_s30, %s1130_s1 }
  0x1a   : > { %p1320_p4 = por %p82_p2, %p81_p1  ;;  %s1583_s15 = smov (%p53_p3, %s1581_s15), 0 }
  0x1b   : > { %s1585_s17 = smov (!%p53_p3, %s55_s17), %s1166_s12  ;;  %p145_p6 = scmp.eq.s32.totalorder %s738_s16, 31 }
  0x1c   : > { %s739_s20 = sadd.s32 4294967294, %s1170_s13   ;;  %p57_p7 = scmp.ge.s32.totalorder %s1585_s17, 8 }
  0x1d   : > { %s134_s21 = sadd.s32 1, %s1134_s30  ;;  %p1331_p8 = por %p145_p6, %p144_p5 }
  0x1e   : > { %s1587_s17 = smov (%p57_p7, %s1585_s17), 0  ;;  %p150_p9 = scmp.ne.s32.totalorder %s1130_s1, %s1126_s0 }
  0x1f   : > { %s1545_s22 = scalar_select %p1331_p8, 1, 0 }
  0x20   : > { %1547 = sst [smem:[#allocation19_spill]] %s1587_s17  ;;  %p151_p10 = scmp.eq.s32.totalorder %s739_s20, 31 }
  0x21   : > { %1546 = sst [smem:[#allocation18_spill]] %s1545_s22  ;;  %s131_s24 = ssub.s32 %s1166_s12, %s1587_s17 }
  0x22   : > { %s63_s23 = sld [smem:[#allocation7 + %s1587_s17]]  ;;  %p132_p11 = scmp.eq.s32.totalorder %s131_s24, 0 }
  0x23   : > { %p1342_p12 = por %p151_p10, %p150_p9  ;;  %s60_s26 = smul.u32 %s1166_s12, %s59_s18 }
  0x24   : > { %s1348_s27 = scalar_select %p132_p11, %s1134_s30, %s134_s21  }
  0x25   : > { %s61_s28 = smul.u32 %s1162_s11, %s59_s18  ;;  %s74_s9 = sadd.s32 1, %s1142_s7 }
  0x26   : > { %s62_s29 = smul.u32 %s1158_s10, %s59_s18  ;;  %p741_p0 = scmp.ge.s32.totalorder %s1170_s13, 32 }
  0x28   : > { %s64_s16 = smul.u32 %s63_s23, %s1587_s17 }
  0x29   : > { %s65_s5 = smul.u32 %s63_s23, %s1583_s15 }
  0x2a   : > { %s66_s22 = smul.u32 %s63_s23, %s1579_s14  ;;  %s67_s4 = ssub.s32 %s60_s26, %s64_s16 }
  0x2b   : > { %s68_s0 = ssub.s32 %s61_s28, %s65_s5 }
  0x2c   : > { %s69_s20 = sor.u32 %s68_s0, %s67_s4  ;;  %s70_s8 = ssub.s32 %s62_s29, %s66_s22 }
  0x2d   : > { %s71_s2 = sor.u32 %s70_s8, %s69_s20  ;;  %167 = sbr.rel (%p741_p0) target bundleno = 103 (0x67), region = 16 }
  0x2e   : > { %p72_p13 = scmp.eq.s32.totalorder %s71_s2, 0 }
  0x30   : > { %s1357_s24 = scalar_select %p72_p13, %s1142_s7, %s74_s9  }
  0x32   : > { %170 = sbr.rel (!%p1320_p4) target bundleno = 103 (0x67), region = 20  ;;  %s172_s18 = sand.u32 (%p1320_p4), 1, %s1142_s7  }
  0x33   : > { %s175_s5 = sld [smem:[#allocation7 + %s1166_s12]] (%p1320_p4)  ;;  %s742_s4 = sshll.u32 (%p1320_p4), %s172_s18, 3 }
  0x34   : > { %s1549_s3 = sld [smem:[#allocation20_spill]] (%p1320_p4)  ;;  %s1375_s18 = scalar_lea.vmem (%p1320_p4), [#allocation9], %s742_s4  }
  0x39   : > { %s176_s0 = smul.u32 %s1166_s12, %s175_s5 }
  0x3a   : > { %s177_s8 = smul.u32 %s1162_s11, %s175_s5 }
  0x3b   : > { %s178_s21 = smul.u32 %s1158_s10, %s175_s5 }
  0x3c   : > { %s743_s2 = sshll.u32 %s177_s8, 1  ;;  %s777_s9 = sshll.u32 %s177_s8, 2 }
  0x3d   : > { %s180_s22 = ssub.s32 3, %s743_s2  ;;  %s186_s23 = sadd.s32 %s777_s9, %s178_s21 }
  0x3e   : > { %p181_p1 = scmp.lt.s32.totalorder %s180_s22, 2  ;;  %s782_s26 = smul.u32 6, %s176_s0 }
  0x40   : > { %s1589_s22 = smov (!%p181_p1, %s180_s22), 2  ;;  %s188_s19 = sadd.s32 %s782_s26, %s186_s23 }
  0x41   : > { %s744_s28 = sshll.u32 %s1589_s22, 2  ;;  %s747_s29 = sshll.u32 %s188_s19, 2 }
  0x42   : > { %s1373_s17 = scalar_lea.vmem %s1549_s3, %s747_s29   ;;  %p748_p2 = scmp.eq.s32.totalorder %s744_s28, 0 }
  0x43   : > { %s1378_s5 = sshrl.u32 (!%p748_p2), %s1589_s22, 1 }
  0x44   : > { %193 = sbr.rel (%p748_p2) target bundleno = 103 (0x67), region = 24  ;;  %p749_p3 = scmp.le.s32.totalorder (!%p748_p2), %s1378_s5, 0 }
  0x49   : > { %671 = sbr.rel (%p749_p3) target bundleno = 86 (0x56), region = 137  ;;  %s1172_s0 = smov (!%p749_p3), %s1375_s18  }
  0x4a   : > { %s1176_s8 = smov (!%p749_p3), %s1373_s17   ;;  %s1180_s21 = smov (!%p749_p3), 0  }
  0x4b   : > { %s1184_s2 = smov (!%p749_p3), 0  }
  0x4e LB: >> { %v210_v0 = vld [vmem:[%s1178_s8] sm:$0xf]  ;;  %v212_v1 = vld [vmem:[%s1178_s8 + $0x8] sm:$0xf]  ;;  %s214_s4 = sadd.s32 1, %s1182_s21  ;;  %s204_s2 = sadd.s32 1, %s1186_s2   ;;  %s1186_s2 = sphi %s1184_s2, %s204_s2   ;;  %s1182_s21 = sphi %s1180_s21, %s1181_s21   ;;  %s1178_s8 = sphi %s1176_s8, %s219_s8   ;;  %s1174_s0 = sphi %s1172_s0, %s220_s0  }
  0x4f   : >> { %211 = vst [vmem:[%s1174_s0] sm:$0xf] %v210_v0  ;;  %p215_p4 = scmp.ge.s32.totalorder %s214_s4, %s1378_s5  ;;  %p203_p5 = scmp.ge.s32.totalorder %s204_s2, %s1378_s5 }
  0x50   : >> { %213 = vst [vmem:[%s1174_s0 + $0x4] sm:$0xf] %v212_v1 }
  0x51   : >> { %s1591_s4 = smov (%p215_p4, %s214_s4), 0  ;;  %206 = sbr.rel (!%p203_p5) target bundleno = 78 (0x4e), region = 143 }
  0x52   : >> { %s750_s9 = sshll.u32 %s1591_s4, 4  ;;  %s751_s23 = sshll.u32 %s1591_s4, 3 }
  0x53   : >> { %s219_s8 = scalar_lea.vmem %s1373_s17, %s750_s9   ;;  %s220_s0 = scalar_lea.vmem %s1375_s18, %s751_s23 [#allocation9]  }
  0x54   : >> { %s1181_s21 = smov %s1591_s4  }
  0x56 PF: > { %s1388_s26 = sand.u32 1, %s1589_s22   ;;  %s778_s19 = sshll.u32 %s1378_s5, 4 }
  0x57   : > { %s1392_s28 = scalar_lea.vmem %s1373_s17, %s778_s19   ;;  %s779_s29 = sshll.u32 %s1378_s5, 3 }
  0x58   : > { %s227_s16 = scalar_lea.vmem %s1375_s18, %s779_s29 [#allocation9]   ;;  %p755_p6 = scmp.le.s32.totalorder %s1388_s26, 0 }
  0x59   : > { %s1188_s20 = smov (!%p755_p6), %s227_s16   ;;  %s1192_s0 = smov (!%p755_p6), %s1392_s28  }
  0x5a   : > { %685 = sbr.rel (%p755_p6) target bundleno = 103 (0x67), region = 148  ;;  %s1196_s8 = smov (!%p755_p6), 0  }
  0x5b   : > { %s1200_s21 = smov (!%p755_p6), 0  }
  0x5f LB: >> { %v237_v2 = vld [vmem:[%s1194_s0] sm:$0xf]  ;;  %s239_s17 = sadd.s32 1, %s1198_s8  ;;  %s231_s21 = sadd.s32 1, %s1202_s21   ;;  %s1202_s21 = sphi %s1200_s21, %s231_s21   ;;  %s1198_s8 = sphi %s1196_s8, %s1197_s8   ;;  %s1194_s0 = sphi %s1192_s0, %s244_s0   ;;  %s1190_s20 = sphi %s1188_s20, %s245_s20  }
  0x60   : >> { %238 = vst [vmem:[%s1190_s20] sm:$0xf] %v237_v2  ;;  %p240_p7 = scmp.ge.s32.totalorder %s239_s17, %s1388_s26  ;;  %p230_p9 = scmp.ge.s32.totalorder %s231_s21, %s1388_s26 }
  0x62   : >> { %s1593_s17 = smov (%p240_p7, %s239_s17), 0  ;;  %233 = sbr.rel (!%p230_p9) target bundleno = 95 (0x5f), region = 154 }
  0x63   : >> { %s756_s22 = sshll.u32 %s1593_s17, 3  ;;  %s757_s18 = sshll.u32 %s1593_s17, 2 }
  0x64   : >> { %s244_s0 = scalar_lea.vmem %s1392_s28, %s756_s22   ;;  %s245_s20 = scalar_lea.vmem %s227_s16, %s757_s18 [#allocation9]  }
  0x65   : >> { %s1197_s8 = smov %s1593_s17  }
  0x67 PF: > { %p758_p10 = scmp.ge.s32.totalorder %s1170_s13, 1  ;;  %p325_p11 = scmp.lt.s32.totalorder %s1170_s13, 33 }
  0x69   : > { %p326_p13 = pnand %p758_p10, %p325_p11 }
  0x6a   : > { %s1550_s5 = sld [smem:[#allocation17_spill]] (!%p326_p13)  ;;  %s332_s9 = sand.u32 (!%p326_p13), 1, %s1138_s6  }
  0x6b   : > { %329 = sbr.rel (%p326_p13) target bundleno = 767 (0x2ff), region = 72  ;;  %s1551_s2 = sld [smem:[#allocation16_spill]] (!%p326_p13) }
  0x6c   : > { %s1552_s4 = sld [smem:[#allocation15_spill]] (!%p326_p13)  ;;  %s1536_s23 = sand.u32 (!%p326_p13), 1, %s1130_s1  }
  0x6d   : > { %s1405_s26 = sshll.u32 (!%p326_p13), %s332_s9, 3  ;;  %s760_s19 = sshll.u32 (!%p326_p13), %s1536_s23, 3 }
  0x6e   : > { %s1554_s9 = sld [smem:[#allocation21_spill]] (!%p326_p13)  ;;  %s1430_s3 = scalar_lea.vmem (!%p326_p13), [#allocation10], %s760_s19 }
  0x70   : > { %v404_v3 = vlaneseq  ;;  %s378_s28 = sld [smem:[#allocation7 + %s1550_s5]] }
  0x71   : > { %p406_p0 = scmp.eq.s32.totalorder %s1551_s2, 0  ;;  %s1415_s29 = sld [smem:[#allocation7 + %s1550_s5]] }
  0x72   : > { %v1410_v4 = vand.u32 127, %v404_v3  ;;  %p407_p1 = scmp.eq.s32.totalorder %s1552_s4, 0  ;;  %s334_s4 = scalar_lea.vmem [#allocation9], %s1405_s26 }
  0x74   : > { %p1418_p2 = pnand %p407_p1, %p406_p0 }
  0x76   : > { %s379_s6 = smul.u32 %s1550_s5, %s378_s28  ;;  %s1555_s5 = sld [smem:[#allocation17_spill]] (!%p1418_p2) }
  0x77   : > { %s380_s20 = smul.u32 %s1551_s2, %s378_s28 }
  0x78   : > { %p386_p3 = scmp.lt.s32.totalorder %s379_s6, 7 }
  0x79   : > { %s761_s0 = sshll.u32 %s380_s20, 1 }
  0x7a   : > { %s1595_s6 = smov (!%p386_p3, %s379_s6), 7  ;;  %p388_p4 = scmp.lt.s32.totalorder %s761_s0, 2 }
  0x7b   : > { %s783_s8 = smul.u32 3, %s1595_s6 }
  0x7c   : > { %s1597_s0 = smov (!%p388_p4, %s761_s0), 2  ;;  %411 = sbr.rel (%p1418_p2) target bundleno = 142 (0x8e), region = 80 }
  0x7d   : > { %s391_s21 = sadd.s32 %s783_s8, %s1597_s0  ;;  %s413_s2 = sld [smem:[#allocation6 + %s1555_s5]] (!%p1418_p2) }
  0x7e   : > { %s762_s17 = sshll.u32 %s391_s21, 3  ;;  %s412_s28 = sld [smem:[#allocation8 + %s1555_s5]] (!%p1418_p2) }
  0x7f   : > { %s1427_s23 = scalar_lea.vmem %s1554_s9, %s762_s17 }
  0x81   : > { %vm420_vm0 = vcmp.eq.s32.totalorder %v1410_v4, 1 }
  0x83   : > { %p414_p5 = scmp.gt.s32.totalorder %s413_s2, 0  ;;  %p763_p6 = scmp.lt.s32.totalorder %s413_s2, 20 }
  0x85   : > { %s1599_s2 = smov (!%p414_p5, %s413_s2), 0 }
  0x86   : > { %s1601_s2 = smov (!%p763_p6, %s1599_s2), 20 }
  0x87   : > { %s418_s6 = scvt.s32.f32 %s1601_s2 }
  0x89   : > { %s419_s20 = smul.f32 %s418_s6, %s412_s28 }
  0x8b   : > { %v421_v5 = vstv %s419_s20 }
  0x8c   : > { %v422_v6 = vsel %vm420_vm0, %v421_v5, 0.0 }
  0x8d   : > { %423 = vst [vmem:[%s1430_s3] sm:$0xff] %v422_v6 }
  0x8e PF: > { %p768_p7 = scmp.eq.s32.totalorder %s1415_s29, 0 }
  0x8f   : > { %s1556_s19 = sld [smem:[#allocation15_spill]] (!%p768_p7) }
  0x90   : > { %427 = sbr.rel (%p768_p7) target bundleno = 746 (0x2ea), region = 84 }
  0x95   : > { %p769_p9 = scmp.ne.s32.totalorder %s1556_s19, 0 }
  0x97   : > { %430 = sbr.rel (%p769_p9) target bundleno = 163 (0xa3), region = 88 }
  0x9c   : > { %vm431_vm1 = vcmask 7168   ;;  %v1207_v7 = vmov -inf   ;;  %v1208_v8 = vmov 0.0  }
  0x9d   : > { %432 = vst.msk [vmem:[#allocation2] sm:$0xff] %vm431_vm1, %v1207_v7 }
  0x9e   : > { %433 = vst.msk [vmem:[#allocation2 + $0x8] sm:$0xff] %vm431_vm1, %v1207_v7 }
  0x9f   : > { %434 = vst.msk [vmem:[#allocation3] sm:$0xff] %vm431_vm1, %v1208_v8 }
  0xa0   : > { %435 = vst.msk [vmem:[#allocation3 + $0x8] sm:$0xff] %vm431_vm1, %v1208_v8 }
  0xa1   : > { %436 = vst.msk [vmem:[#allocation4] sm:$0xff] %vm431_vm1, %v1208_v8 }
  0xa2   : > { %437 = vst.msk [vmem:[#allocation4 + $0x8] sm:$0xff] %vm431_vm1, %v1208_v8 }
  0xa3 PF: > { %s1557_s16 = sld [smem:[#allocation15_spill]]  ;;  %v438_v9 = vld [vmem:[%s334_s4] sm:$0xf]  ;;  %v439_v11 = vld [vmem:[%s334_s4 + $0x4] sm:$0xf]  ;;  %v1209_v13 = vmov 0  }
  0xa4   : > { %v440_v10 = vunpack.c.l.bf16 %v438_v9  ;;  %v441_v12 = vunpack.c.l.bf16 %v439_v11  ;;  %959 = vset.pattern.permute.xlu1 %v1209_v13  ;;  %960 = vset.pattern.permute.xlu2 %v1209_v13  ;;  %v487_v14 = vld [vmem:[%s1427_s23] sm:$0xff]  ;;  %v488_v17 = vld [vmem:[%s1427_s23 + $0x8] sm:$0xff]  ;;  %vm482_vm2 = vcmask 7168  }
  0xa5   : > { %961 = vset.pattern.permute.xlu0 %v1209_v13  ;;  %v442_v19 = vld [vmem:[#allocation2] sm:$0xff]  ;;  %v443_v23 = vld [vmem:[#allocation2 + $0x8] sm:$0xff] }
  0xa6   : > { %444 = vmax.xlane.f32.xlu0 %v440_v10  ;;  %v450_v54 = vld [vmem:[#allocation3] sm:$0xff] }
  0xa7   : > { %v451_v59 = vld [vmem:[#allocation3 + $0x8] sm:$0xff] }
  0xa8   : > { %v501_v46 = vld [vmem:[#allocation4] sm:$0xff] }
  0xa9   : > { %s770_s29 = sshll.u32 %s1557_s16, 7  ;;  %v502_v45 = vld [vmem:[#allocation4 + $0x8] sm:$0xff]  ;;  %p771_p10 = scmp.ne.s32.totalorder %s1557_s16, 1 }
  0xaa   : > { %v490_v15 = vstv %s770_s29  ;;  %s1558_s23 = sld [smem:[#allocation16_spill]] (!%p771_p10) }
  0xab   : > { %v491_v16 = vsub.s32 %v487_v14, %v490_v15  ;;  %v492_v18 = vsub.s32 %v488_v17, %v490_v15  ;;  %s1559_s0 = sld [smem:[#allocation17_spill]] (!%p771_p10) }
  0xad   : > { %494 = vperm.xlu2 %960, %v491_v16  }
  0xae   : > { %446 = vmax.xlane.f32.xlu0 %v441_v12 }
  0xb0   : > { %s772_s26 = sshll.u32 (!%p771_p10), %s1558_s23, 4 }
  0xb1   : > { %s562_s8 = sld [smem:[#allocation8 + %s1559_s0]] (!%p771_p10) }
  0xb5   : > { %497 = vperm.xlu2 %960, %v492_v18  }
 0x107   : > { %v495_v27 = vpop.permute.xlu2 %494 }
 0x108   : > { %vm499_vm3 = vcmp.eq.s32.totalorder %v1410_v4, %v495_v27 }
 0x109   : > { %vm503_vm4 = vmpackc.low %vm499_vm3, %vm499_vm3 }
 0x10a   : > { %v505_v29 = vsel %vm503_vm4, %v438_v9, 0 }
 0x10b   : > { %v507_v31 = vunpack.c.l.bf16 %v505_v29 }
 0x10d   : > { %509 = vadd.xlane.f32.xlu0 %v507_v31 }
 0x10f   : > { %v498_v28 = vpop.permute.xlu2 %497 }
 0x110   : > { %vm500_vm5 = vcmp.eq.s32.totalorder %v1410_v4, %v498_v28 }
 0x111   : > { %vm504_vm6 = vmpackc.low %vm500_vm5, %vm500_vm5 }
 0x112   : > { %v506_v30 = vsel %vm504_vm6, %v439_v11, 0 }
 0x113   : > { %v508_v32 = vunpack.c.l.bf16 %v506_v30 }
 0x119   : > { %v445_v20 = vpop.xlane.xlu0 %444 }
 0x11a   : > { %v448_v21 = vmax.f32 %v442_v19, %v445_v20 }
 0x11c   : > { %v452_v22 = vsub.f32 %v442_v19, %v448_v21  ;;  %485 = vst.msk [vmem:[#allocation2] sm:$0xff] %vm482_vm2, %v448_v21  ;;  %462 = vperm.xlu1 %959, %v448_v21  }
 0x11e   : > { %v454_v51 = vmul.f32 1.442695, %v452_v22 }
 0x121   : > { %v447_v24 = vpop.xlane.xlu0 %446 }
 0x122   : > { %v449_v25 = vmax.f32 %v443_v23, %v447_v24 }
 0x124   : > { %v453_v26 = vsub.f32 %v443_v23, %v449_v25  ;;  %486 = vst.msk [vmem:[#allocation2 + $0x8] sm:$0xff] %vm482_vm2, %v449_v25  ;;  %467 = vperm.xlu1 %959, %v449_v25  }
 0x126   : > { %v456_v52 = vmul.f32 1.442695, %v453_v26 }
 0x14e   : > { %511 = vadd.xlane.f32.xlu1 %v508_v32 }
 0x180   : > { %v510_v42 = vpop.xlane.xlu0 %509 }
 0x181   : > { %v513_v44 = vpack.c.bf16 %v510_v42, %v510_v42 }
 0x183   : > { %v515_v48 = vunpack.c.l.bf16 %v513_v44 }
 0x185   : > { %v517_v50 = vadd.f32 %v515_v48, %v501_v46 }
 0x187   : > { %519 = vst.msk [vmem:[#allocation4] sm:$0xff] %vm482_vm2, %v517_v50 }
 0x18e   : > { %v463_v33 = vpop.permute.xlu1 %462 }
 0x18f   : > { %v470_v34 = vsub.f32 %v440_v10, %v463_v33 }
 0x191   : > { %v472_v35 = vmul.f32 1.442695, %v470_v34 }
 0x193   : > { %962 = vpow2.f32 %v472_v35 }
 0x196   : > { %v468_v36 = vpop.permute.xlu1 %467 }
 0x197   : > { %v471_v37 = vsub.f32 %v441_v12, %v468_v36 }
 0x199   : > { %v963_v38 = vpop.eup %962  ;;  %v474_v39 = vmul.f32 1.442695, %v471_v37 }
 0x19a   : > { %476 = vadd.xlane.f32.xlu2 %v963_v38 }
 0x19b   : > { %964 = vpow2.f32 %v474_v39 }
 0x19c   : > { %966 = vpow2.f32 %v454_v51 }
 0x19d   : > { %968 = vpow2.f32 %v456_v52 }
 0x1a1   : > { %v965_v40 = vpop.eup %964 }
 0x1a2   : > { %478 = vadd.xlane.f32.xlu0 %v965_v40  ;;  %v967_v53 = vpop.eup %966 }
 0x1a3   : > { %v458_v55 = vmul.f32 %v967_v53, %v450_v54  ;;  %v969_v58 = vpop.eup %968 }
 0x1a4   : > { %v459_v60 = vmul.f32 %v969_v58, %v451_v59 }
 0x1c1   : > { %v512_v41 = vpop.xlane.xlu1 %511 }
 0x1c2   : > { %v514_v43 = vpack.c.bf16 %v512_v41, %v512_v41 }
 0x1c4   : > { %v516_v47 = vunpack.c.l.bf16 %v514_v43 }
 0x1c6   : > { %v518_v49 = vadd.f32 %v516_v47, %v502_v45 }
 0x1c8   : > { %520 = vst.msk [vmem:[#allocation4 + $0x8] sm:$0xff] %vm482_vm2, %v518_v49 }
 0x20d   : > { %v477_v56 = vpop.xlane.xlu2 %476 }
 0x20e   : > { %v480_v57 = vadd.f32 %v477_v56, %v458_v55 }
 0x210   : > { %483 = vst.msk [vmem:[#allocation3] sm:$0xff] %vm482_vm2, %v480_v57 }
 0x214   : > { %524 = sbr.rel (%p771_p10) target bundleno = 746 (0x2ea), region = 92 }
 0x215   : > { %v479_v61 = vpop.xlane.xlu0 %478 }
 0x216   : > { %v481_v62 = vadd.f32 %v479_v61, %v459_v60 }
 0x218   : > { %484 = vst.msk [vmem:[#allocation3 + $0x8] sm:$0xff] %vm482_vm2, %v481_v62 }
 0x219   : > { %v527_v63 = vld [vmem:[#allocation3] sm:$0xff]  ;;  %v541_v0 = vshrl.u32 %v404_v3, 7  ;;  %v543_v5 = vstv %s772_s26  ;;  %v525_v7 = vld [vmem:[#allocation2] sm:$0xff]  ;;  %v526_v10 = vld [vmem:[#allocation2 + $0x8] sm:$0xff]  ;;  %vm565_vm9 = vcmp.eq.s32.totalorder %v1410_v4, 0 }
 0x21a   : > { %970 = vlog2.f32 %v527_v63  ;;  %v535_v14 = vld [vmem:[#allocation4] sm:$0xff]  ;;  %v536_v16 = vld [vmem:[#allocation4 + $0x8] sm:$0xff] }
 0x21b   : > { %v542_v2 = vadd.s32 8, %v541_v0  ;;  %v544_v8 = vadd.s32 %v543_v5, %v541_v0  ;;  %v564_v31 = vld [vmem:[%s1430_s3] sm:$0xff] }
 0x21d   : > { %v545_v12 = vadd.s32 %v543_v5, %v542_v2  ;;  %vm546_vm7 = vcmp.lt.s32.totalorder %v544_v8, 20 }
 0x21f   : > { %v528_v1 = vld [vmem:[#allocation3 + $0x8] sm:$0xff]  ;;  %vm547_vm8 = vcmp.lt.s32.totalorder %v545_v12, 20 }
 0x220   : > { %972 = vlog2.f32 %v528_v1  ;;  %v971_v6 = vpop.eup %970 }
 0x221   : > { %v530_v11 = vmul.f32 0.6931472, %v971_v6 }
 0x223   : > { %v533_v15 = vadd.f32 %v530_v11, %v525_v7 }
 0x225   : > { %v537_v3 = vsub.f32 %v533_v15, %v535_v14 }
 0x226   : > { %v973_v9 = vpop.eup %972 }
 0x227   : > { %v532_v13 = vmul.f32 0.6931472, %v973_v9  ;;  %v548_v19 = vsel %vm546_vm7, %v537_v3, 0.0 }
 0x228   : > { %v550_v21 = vsel %vm482_vm2, %v548_v19, 0.0 }
 0x229   : > { %v534_v17 = vadd.f32 %v532_v13, %v526_v10 }
 0x22b   : > { %v538_v18 = vsub.f32 %v534_v17, %v536_v16 }
 0x22d   : > { %v549_v20 = vsel %vm547_vm8, %v538_v18, 0.0 }
 0x22e   : > { %v551_v22 = vsel %vm482_vm2, %v549_v20, 0.0 }
 0x22f   : > { %v552_v23 = vadd.f32 %v551_v22, %v550_v21 }
 0x231   : > { %553 = vadd.xlane.f32.xlu0 %v552_v23 }
 0x2a4   : > { %v554_v24 = vpop.xlane.xlu0 %553 }
 0x2a5   : > { %v555_v25 = vrot.slane %v554_v24, 4 }
 0x2a7   : > { %v556_v26 = vadd.f32 %v555_v25, %v554_v24 }
 0x2a9   : > { %v557_v27 = vrot.slane %v556_v26, 2 }
 0x2ab   : > { %v558_v28 = vadd.f32 %v557_v27, %v556_v26 }
 0x2ad   : > { %v559_v29 = vrot.slane %v558_v28, 1 }
 0x2af   : > { %v560_v30 = vadd.f32 %v559_v29, %v558_v28 }
 0x2b1   : > { %784 = vpush %v560_v30 }
 0x2e2   : > { %s785_s21 = spop %784 }
 0x2e3   : > { %s563_s17 = smul.f32 %s785_s21, %s562_s8 }
 0x2e5   : > { %v566_v32 = vstv %s563_s17 }
 0x2e6   : > { %v567_v33 = vsel %vm565_vm9, %v566_v32, 0.0 }
 0x2e7   : > { %v568_v34 = vadd.f32 %v567_v33, %v564_v31 }
 0x2e9   : > { %569 = vst [vmem:[%s1430_s3] sm:$0xff] %v568_v34 }
 0x2ea PF: > { %s1560_s22 = sld [smem:[#allocation17_spill]]  ;;  %s583_s20 = sshll.u32 %s1430_s3, 4  ;;  %s584_s20 = int_to_ptr.vmem [resolvable:$true] %s583_s20 }
 0x2eb   : > { %s1562_s2 = sld [smem:[#allocation22_spill]]  ;;  %s1564_s16 = sand.u32 1, %s1130_s1  }
 0x2ec   : > { %s571_s29 = scalar_lea.sflag [#allocation11], %s1564_s16 }
 0x2f0   : > { %s774_s9 = sshll.u32 %s1560_s22, 3 }
 0x2f1   : > { %s1563_s28 = smov %s1562_s2  ;;  %s581_s6 = scalar_lea.hbm %s1562_s2, %s774_s9 }
 0x2f2   : > { %s585_s19 = sshll.u32 %s581_s6, 4  ;;  %s1030_s21 = scalar_lea.hbm %s1563_s28, 64  ;;  %s586_s19 = int_to_ptr.hbm [resolvable:$true] %s585_s19 }
 0x2f3   : > { %s1024_s23 = sshra.s32 %s586_s19, 4  ;;  %s1025_s23 = int_to_ptr.hbm [resolvable:$true] %s1024_s23 }
 0x2f4   : > { %s1026_s26 = scalar_lea.hbm %s1025_s23, 8  ;;  %p1031_p1 = scmp.lt.s32.totalorder %s1025_s23, %s1563_s28 }
 0x2f5   : > { %p1027_p11 = scmp.ne.s32.totalorder %s1025_s23, %s1026_s26  ;;  %p1032_p2 = scmp.lt.s32.totalorder %s1030_s21, %s1026_s26 }
 0x2f7   : > { %p1028_p13 = pnand %p1027_p11, %p1331_p8  ;;  %p1033_p3 = por %p1032_p2, %p1031_p1 }
 0x2f9   : > { %p1029_p0 = pneg %p1028_p13 }
 0x2fb   : > { %p1034_p4 = pnand %p1033_p3, %p1029_p0 }
 0x2fd   : > { %1037 = shalt.err (!%p1034_p4)
}
 0x2fe   : > { %786 = dma.vmem_to_hbm [thread:$0]  (%p1331_p8), %s584_s20, 128, %s586_s19, %s571_s29  }
 0x2ff PF: > { %s1565_s3 = sld [smem:[#allocation14_spill]]  ;;  %p792_p5 = scmp.ge.s32.totalorder %s1170_s13, 2 }
 0x301   : > { %p789_p6 = pnand %p792_p5, %p1342_p12 }
 0x303   : > { %p790_p7 = pneg %p789_p6 }
 0x305   : > { %s597_s9 = sand.u32 1, %s1565_s3  }
 0x306   : > { %s598_s4 = scalar_lea.sflag [#allocation11], %s597_s9 }
 0x307   : > { %1121 = dma.done.wait (%p790_p7), %s598_s4, 128  }
 0x308   : > { %1123 = vsyncadd (%p790_p7), %s598_s4, 4294967168  ;;  %s36_s13 = sadd.s32 1, %s1170_s13   ;;  %s1566_s18 = sld [smem:[#allocation19_spill]] }
 0x309   : > { %p33_p9 = scmp.ge.s32.totalorder %s36_s13, 34   ;;  %s1567_s0 = smov %s1130_s1 }
 0x30a   : > { %s1568_s1 = smov %s1134_s30  ;;  %s1569_s30 = smov %s1348_s27 }
 0x30b   : > { %s1570_s6 = smov %s1142_s7  ;;  %s1571_s7 = smov %s1357_s24 }
 0x30c   : > { %s1572_s8 = smov %s1158_s10  ;;  %s1573_s2 = smov %s1162_s11 }
 0x30d   : > { %s1574_s9 = smov %s1166_s12  ;;  %s1575_s10 = smov %s1579_s14 }
 0x30e   : > { %s1576_s11 = smov %s1583_s15  ;;  %s1577_s12 = smov %s1566_s18 }
 0x30f   :  { %35 = sbr.rel (!%p33_p9) target bundleno = 18 (0x12), region = 165 }
 0x314   :  { %604 = vsyncpa [#allocation11], 1 }
 0x315   :  { %606 = vsyncpa [#allocation11 + $0x1], 1 }

</bundles_post_ra>
